<compile_context>
chip_gen: v5e
topology: v5e:2x2
jax: 0.10.0
libtpu: 0.0.40
codegen_flags: <defaults>
</compile_context>

<pallas_src>
import functools

import jax
import jax.numpy as jnp
from jax.experimental import pallas as pl
from jax.experimental.pallas import tpu as pltpu

FEATS = 768      # matches `feats = 768` in the module
_LANE = 128      # TPU lane width


def _round_up(x, m):
    return (x + m - 1) // m * m


def _pool_embed_kernel(patches_ref, wpe_ref, bpe_ref, out_ref, acc_ref, *,
                       inv_norm):
    """One grid step == (batch tile, patch tile).

    patches_ref : (bm, pt, pd_p)  bf16 raw pixels, patchified, zero-padded
    wpe_ref     : (pd_p, FEATS)   bf16 patch-embed weight (zero-padded K rows)
    bpe_ref     : (1, FEATS)      f32  patch-embed bias
    out_ref     : (bm, FEATS)     f32  pooled features for this batch tile
    acc_ref     : (bm, pd_p)      f32  running patch-sum accumulator (scratch)
    """
    p_idx = pl.program_id(1)

    @pl.when(p_idx == 0)
    def _():
        acc_ref[...] = jnp.zeros_like(acc_ref)

    # Accumulate the patch sum.  The avg-pool is pulled in front of the linear
    # patch embed (they commute since the embed is linear), so only a
    # (bm, pd_p) vector per batch row survives to the matmul.
    acc_ref[...] += jnp.sum(patches_ref[...].astype(jnp.float32), axis=1)

    @pl.when(p_idx == pl.num_programs(1) - 1)
    def _():
        # mean over patches and the x/255.0 input scaling, folded into one mul
        pooled = (acc_ref[...] * jnp.float32(inv_norm)).astype(jnp.bfloat16)
        feats = jnp.dot(pooled, wpe_ref[...],
                        preferred_element_type=jnp.float32)   # (bm, FEATS)
        out_ref[...] = feats + bpe_ref[...]


def model_forward(x_nchw, params, *, patch=8):
    """x_nchw: (bs, 3, H, W) float32 pixels in [0, 255]. Returns (n_head, bs, 1)."""
    bs, c, h, w = x_nchw.shape
    assert h % patch == 0 and w % patch == 0
    hp, wp = h // patch, w // patch
    num_patches = hp * wp
    patch_dim = c * patch * patch

    w_pe, b_pe, w_heads, b_heads = params
    n_head = w_heads.shape[1]

    # ---- host-side layout plumbing (pure reshape / pad / cast) -------------
    # NCHW -> (bs, num_patches, C*p*p); bf16 halves HBM->VMEM DMA bytes.
    patches = x_nchw.reshape(bs, c, hp, patch, wp, patch)
    patches = patches.transpose(0, 2, 4, 1, 3, 5)
    patches = patches.reshape(bs, num_patches, patch_dim).astype(jnp.bfloat16)

    # zero-pad K (patch_dim) up to a lane multiple: 192 -> 256, full MXU passes
    pd_p = _round_up(patch_dim, _LANE)

    # batch tile: fold the whole batch into one grid step when small; tile by
    # 128 rows (MXU height) for large batches (keeps the axis core-parallel).
    bm = bs if bs <= 128 else 128
    bs_p = _round_up(bs, bm)

    # patch tile: whole slab when small; 512-patch tiles for big images so the
    # double-buffered input tile stays VMEM-safe (v7x has only 64 MiB VMEM).
    pt = num_patches if num_patches <= 512 else 512
    np_p = _round_up(num_patches, pt)

    patches = jnp.pad(
        patches,
        ((0, bs_p - bs), (0, np_p - num_patches), (0, pd_p - patch_dim)))

    w_pe_p = jnp.pad(w_pe, ((0, pd_p - patch_dim), (0, 0))).astype(jnp.bfloat16)
    b_pe_p = b_pe.reshape(1, FEATS).astype(jnp.float32)

    # zero-padded patches contribute 0 to the sum; divide by the TRUE count.
    inv_norm = 1.0 / (255.0 * float(num_patches))

    kernel = functools.partial(_pool_embed_kernel, inv_norm=inv_norm)

    pooled_feats = pl.pallas_call(
        kernel,
        out_shape=jax.ShapeDtypeStruct((bs_p, FEATS), jnp.float32),
        grid=(bs_p // bm, np_p // pt),
        in_specs=[
            pl.BlockSpec((bm, pt, pd_p), lambda b, p: (b, p, 0)),
            pl.BlockSpec((pd_p, FEATS), lambda b, p: (0, 0)),
            pl.BlockSpec((1, FEATS), lambda b, p: (0, 0)),
        ],
        out_specs=pl.BlockSpec((bm, FEATS), lambda b, p: (b, 0)),
        scratch_shapes=[pltpu.VMEM((bm, pd_p), jnp.float32)],
        compiler_params=pltpu.CompilerParams(
            dimension_semantics=("parallel", "arbitrary")),
    )(patches, w_pe_p, b_pe_p)

    pooled_feats = pooled_feats[:bs]                         # drop batch pad

    # n_head independent nn.Linear(768, 1) heads == one (bs,768)@(768,n_head)
    # projection.  Done once outside the kernel (per perf review): the kernel
    # output stays lane-dense (768 = 6*128) and the tiny head matmul is a
    # single XLA op instead of a per-grid-step degenerate MXU pass.
    logits = jnp.dot(pooled_feats, w_heads,
                     preferred_element_type=jnp.float32) + b_heads  # (bs, n_head)

    # torch: logits = zeros(n_head, bs, 1); logits[i] = heads[i](features)
    return logits.T[:, :, None]


def init_params(key, *, patch=8, in_ch=3, n_head=5):
    patch_dim = in_ch * patch * patch
    k1, k2, k3, k4 = jax.random.split(key, 4)
    w_pe = jax.random.normal(k1, (patch_dim, FEATS), jnp.float32) * 0.02
    b_pe = jax.random.normal(k2, (1, FEATS), jnp.float32) * 0.02
    # n_head independent nn.Linear(768, 1) layers, stacked along the last axis
    w_heads = jax.random.normal(k3, (FEATS, n_head), jnp.float32) * 0.02
    b_heads = jax.random.normal(k4, (1, n_head), jnp.float32) * 0.02
    return (w_pe, b_pe, w_heads, b_heads)


def _reference_forward(x_nchw, params, *, patch=8):
    """Pure-jnp f32 reference with the ORIGINAL op order (embed -> pool)."""
    bs, c, h, w = x_nchw.shape
    hp, wp = h // patch, w // patch
    num_patches = hp * wp
    patch_dim = c * patch * patch
    w_pe, b_pe, w_heads, b_heads = params

    p = x_nchw.reshape(bs, c, hp, patch, wp, patch)
    p = p.transpose(0, 2, 4, 1, 3, 5).reshape(bs, num_patches, patch_dim)
    p = p.astype(jnp.float32) / 255.0
    feats = jnp.einsum("bpd,df->bpf", p, w_pe) + b_pe[None]   # (bs, np, FEATS)
    pooled = jnp.mean(feats, axis=1)                          # (bs, FEATS)
    logits = pooled @ w_heads + b_heads                       # (bs, n_head)
    return logits.T[:, :, None]


if __name__ == "__main__":
    key = jax.random.PRNGKey(0)
    k_params, k_x = jax.random.split(key)

    bs, in_ch, H, W = 2, 3, 16, 16
    n_head = 5

    params = init_params(k_params, patch=8, in_ch=in_ch, n_head=n_head)
    # deterministic "image" input with pixel values in [0, 255]
    x = jax.random.uniform(k_x, (bs, in_ch, H, W), jnp.float32,
                           minval=0.0, maxval=255.0)

    logits = model_forward(x, params, patch=8)
    logits = jax.block_until_ready(logits)

    assert logits.shape == (n_head, bs, 1), logits.shape

    # sanity check against an f32 pure-jnp reference (loose tol: bf16 MXU path)
    ref = _reference_forward(x, params, patch=8)
    assert jnp.allclose(logits, ref, rtol=5e-2, atol=5e-2), (
        "max abs err:", float(jnp.max(jnp.abs(logits - ref))))

    print("KERNEL_OK")
</pallas_src>

<mosaic_0001>
module attributes {stable_mosaic.version = 11 : i64} {
  func.func @_pool_embed_kernel(%arg0: i32, %arg1: i32, %arg2: memref<2x4x256xbf16, #tpu.memory_space<vmem>>, %arg3: memref<256x768xbf16, #tpu.memory_space<vmem>>, %arg4: memref<1x768xf32, #tpu.memory_space<vmem>>, %arg5: memref<2x768xf32, #tpu.memory_space<vmem>>, %arg6: memref<2x256xf32, #tpu.memory_space<vmem>>) attributes {dimension_semantics = [#tpu.dimension_semantics<parallel>, #tpu.dimension_semantics<arbitrary>], iteration_bounds = array<i64: 1, 1>, scalar_prefetch = 0 : i64, scratch_operands = 1 : i64, tpu.core_type = #tpu.core_type<tc>, window_params = [{transform_indices = @transform_0, window_bounds = array<i64: 2, 4, 256>}, {pipeline_mode = #tpu.pipeline_mode<synchronous>, transform_indices = @transform_1, window_bounds = array<i64: 256, 768>}, {pipeline_mode = #tpu.pipeline_mode<synchronous>, transform_indices = @transform_2, window_bounds = array<i64: 1, 768>}, {transform_indices = @transform_3, window_bounds = array<i64: 2, 768>}]} {
    %c0_i32 = arith.constant 0 : i32
    %0 = arith.cmpi eq, %arg1, %c0_i32 : i32
    %1 = arith.extui %0 : i1 to i32
    %c0_i32_0 = arith.constant 0 : i32
    %2 = arith.cmpi ne, %1, %c0_i32_0 : i32
    scf.if %2 {
      %cst_9 = arith.constant 0.000000e+00 : f32
      %12 = vector.broadcast %cst_9 : f32 to vector<2x256xf32>
      %c0_10 = arith.constant 0 : index
      %c0_11 = arith.constant 0 : index
      %13 = vector.load %arg6[%c0_10, %c0_11] : memref<2x256xf32, #tpu.memory_space<vmem>>, vector<2x256xf32>
      tpu.vector_store %arg6[%c0_10, %c0_11], %12 {strides = array<i32>} : memref<2x256xf32, #tpu.memory_space<vmem>>, vector<2x256xf32>,
    } else {
    }
    %c0 = arith.constant 0 : index
    %c0_1 = arith.constant 0 : index
    %3 = vector.load %arg6[%c0, %c0_1] : memref<2x256xf32, #tpu.memory_space<vmem>>, vector<2x256xf32>
    %c0_2 = arith.constant 0 : index
    %c0_3 = arith.constant 0 : index
    %c0_4 = arith.constant 0 : index
    %4 = vector.load %arg2[%c0_2, %c0_3, %c0_4] : memref<2x4x256xbf16, #tpu.memory_space<vmem>>, vector<2x4x256xbf16>
    %5 = arith.extf %4 : vector<2x4x256xbf16> to vector<2x4x256xf32>
    %cst = arith.constant dense<0.000000e+00> : vector<2x256xf32>
    %6 = vector.multi_reduction <add>, %5, %cst [1] : vector<2x4x256xf32> to vector<2x256xf32>
    %7 = arith.addf %3, %6 : vector<2x256xf32>
    %c0_5 = arith.constant 0 : index
    %c0_6 = arith.constant 0 : index
    %8 = vector.load %arg6[%c0_5, %c0_6] : memref<2x256xf32, #tpu.memory_space<vmem>>, vector<2x256xf32>
    tpu.vector_store %arg6[%c0_5, %c0_6], %7 {strides = array<i32>} : memref<2x256xf32, #tpu.memory_space<vmem>>, vector<2x256xf32>,
    %c0_i32_7 = arith.constant 0 : i32
    %9 = arith.cmpi eq, %arg1, %c0_i32_7 : i32
    %10 = arith.extui %9 : i1 to i32
    %c0_i32_8 = arith.constant 0 : i32
    %11 = arith.cmpi ne, %10, %c0_i32_8 : i32
    scf.if %11 {
      %c0_9 = arith.constant 0 : index
      %c0_10 = arith.constant 0 : index
      %12 = vector.load %arg6[%c0_9, %c0_10] : memref<2x256xf32, #tpu.memory_space<vmem>>, vector<2x256xf32>
      %cst_11 = arith.constant 9.80392214E-4 : f32
      %13 = vector.broadcast %cst_11 : f32 to vector<2x256xf32>
      %14 = arith.mulf %12, %13 : vector<2x256xf32>
      %15 = arith.truncf %14 : vector<2x256xf32> to vector<2x256xbf16>
      %c0_12 = arith.constant 0 : index
      %c0_13 = arith.constant 0 : index
      %16 = vector.load %arg3[%c0_12, %c0_13] : memref<256x768xbf16, #tpu.memory_space<vmem>>, vector<256x768xbf16>
      %cst_14 = arith.constant dense<0.000000e+00> : vector<2x768xf32>
      %17 = tpu.matmul %15, %16, %cst_14 {dimension_numbers = #tpu.dot_dimension_numbers<[1], [0], [0], [1], [0, 0, 1, 1], [], []>} : vector<2x256xbf16>, vector<256x768xbf16>, vector<2x768xf32> -> vector<2x768xf32>
      %c0_15 = arith.constant 0 : index
      %c0_16 = arith.constant 0 : index
      %18 = vector.load %arg4[%c0_15, %c0_16] : memref<1x768xf32, #tpu.memory_space<vmem>>, vector<1x768xf32>
      %19 = vector.broadcast %18 : vector<1x768xf32> to vector<2x768xf32>
      %20 = arith.addf %17, %19 : vector<2x768xf32>
      %c0_17 = arith.constant 0 : index
      %c0_18 = arith.constant 0 : index
      %21 = vector.load %arg5[%c0_17, %c0_18] : memref<2x768xf32, #tpu.memory_space<vmem>>, vector<2x768xf32>
      tpu.vector_store %arg5[%c0_17, %c0_18], %20 {strides = array<i32>} : memref<2x768xf32, #tpu.memory_space<vmem>>, vector<2x768xf32>,
    } else {
    }
    return
  }
  func.func @transform_0(%arg0: i32, %arg1: i32) -> (i32, i32, i32) {
    %c0_i32 = arith.constant 0 : i32
    %c0_i32_0 = arith.constant 0 : i32
    return %arg0, %arg1, %c0_i32 : i32, i32, i32
  }
  func.func @transform_1(%arg0: i32, %arg1: i32) -> (i32, i32) {
    %c0_i32 = arith.constant 0 : i32
    %c0_i32_0 = arith.constant 0 : i32
    %c0_i32_1 = arith.constant 0 : i32
    return %c0_i32, %c0_i32_0 : i32, i32
  }
  func.func @transform_2(%arg0: i32, %arg1: i32) -> (i32, i32) {
    %c0_i32 = arith.constant 0 : i32
    %c0_i32_0 = arith.constant 0 : i32
    %c0_i32_1 = arith.constant 0 : i32
    return %c0_i32, %c0_i32_0 : i32, i32
  }
  func.func @transform_3(%arg0: i32, %arg1: i32) -> (i32, i32) {
    %c0_i32 = arith.constant 0 : i32
    %c0_i32_0 = arith.constant 0 : i32
    return %arg0, %c0_i32 : i32, i32
  }
}

</mosaic_0001>

<bundles_post_ra>
// kernel: tpu_custom_call.1
= control target key start
LH: loop header
LB: loop body
LE: loop exit
PB: predicated region body
PF: predicated region fallthrough
CT: control target
= control target key end

     0   :  { %8 = vsyncpa [#allocation4], 0  ;;  %s1595_s0 = inlined_call_operand.hbm [shape: bf16[2,4,256], index: 0, kind: input, shape index: {}]   ;;  %s1596_s1 = inlined_call_operand.hbm [shape: bf16[256,768], index: 1, kind: input, shape index: {}]   ;;  %s1597_s2 = inlined_call_operand.hbm [shape: f32[1,768], index: 2, kind: input, shape index: {}]   ;;  %s1598_s3 = inlined_call_operand.hbm [shape: f32[2,768], index: 3, kind: output, shape index: {}]  }
   0x1   :  { %9 = vsyncpa [#allocation7], 0  ;;  %s28_s14 = sshll.u32 %s1596_s1, 4  ;;  %s29_s14 = int_to_ptr.hbm [resolvable:$true] %s28_s14 }
   0x2   :  { %10 = vsyncpa [#allocation5], 0  ;;  %s1528_s15 = smov [#allocation6]   ;;  %s15_s19 = sshll.u32 %s1595_s0, 4  ;;  %s16_s19 = int_to_ptr.hbm [resolvable:$true] %s15_s19 }
   0x3   :  { %s30_s16 = sshll.u32 %s1528_s15, 4  ;;  %s1529_s20 = smov 384   ;;  %s31_s16 = int_to_ptr.vmem [resolvable:$true] %s30_s16 }
   0x4   :  { %s1530_s21 = smov 24   ;;  %s1531_s22 = smov [#allocation3]  }
   0x5   :  { %36 = dma.hbm_to_vmem [thread:$0]  %s29_s14, 12288, %s31_s16, [#allocation7], %s1529_s20, %s1529_s20, %s1530_s21  }
   0x6   :  { %s17_s23 = sshll.u32 %s1531_s22, 4  ;;  %s1532_s24 = smov 64   ;;  %s18_s23 = int_to_ptr.vmem [resolvable:$true] %s17_s23 }
   0x7   :  { %s1533_s25 = smov 4   ;;  %s42_s27 = sshll.u32 %s1597_s2, 4  ;;  %s43_s27 = int_to_ptr.hbm [resolvable:$true] %s42_s27 }
   0x8   :  { %23 = dma.hbm_to_vmem [thread:$0]  %s16_s19, 128, %s18_s23, [#allocation4], %s1532_s24, %s1532_s24, %s1533_s25  }
   0x9   :  { %s1534_s28 = smov [#allocation8]  }
   0xa   :  { %s44_s29 = sshll.u32 %s1534_s28, 4  ;;  %s45_s29 = int_to_ptr.vmem [resolvable:$true] %s44_s29 }
   0xb   :  { %47 = dma.hbm_to_vmem [thread:$0]  %s43_s27, 96, %s45_s29, [#allocation7]  }
   0xc   :  { %1522 = dma.done.wait [#allocation4], 128  }
   0xd   :  { %1523 = vsyncadd [#allocation4], 4294967168 }
   0xe   :  { %1524 = dma.done.wait [#allocation7], 12384  }
   0xf   :  { %1525 = vsyncadd [#allocation7], 4294954912  ;;  %v1535_v0 = vmov 0.0   ;;  %v1103_v1 = vld [vmem:[#allocation6 + $0x150] sm:$0xf]  ;;  %vm83_vm0 = vcmask 1043456  }
  0x10   :  { %64 = vst [vmem:[#allocation2] sm:$0xf] %v1535_v0  ;;  %v1362_v2 = vld [vmem:[#allocation6 + $0x164] sm:$0xf0]  ;;  %v1295_v3 = vld [vmem:[#allocation6 + $0x2d0] sm:$0xf] }
  0x11   :  { %v1104_v4 = vor.u32 %v1362_v2, %v1103_v1  ;;  %v1410_v5 = vld [vmem:[#allocation6 + $0x2e4] sm:$0xf0]  ;;  %v1359_v6 = vld [vmem:[#allocation6 + $0x154] sm:$0xf]  ;;  %v1105_v7 = vld [vmem:[#allocation6 + $0x168] sm:$0xf0] }
  0x12   :  { %v1296_v8 = vor.u32 %v1410_v5, %v1295_v3  ;;  %v1108_v9 = vor.u32 %v1359_v6, %v1105_v7  ;;  %v1407_v10 = vld [vmem:[#allocation6 + $0x2d4] sm:$0xf]  ;;  %v1297_v11 = vld [vmem:[#allocation6 + $0x2e8] sm:$0xf0]  ;;  %v1079_v12 = vld [vmem:[#allocation6 + $0x120] sm:$0xf] }
  0x13   :  { %740 = vmatpush.bf16.msra.mxu0 %v1104_v4  ;;  %v1300_v13 = vor.u32 %v1407_v10, %v1297_v11  ;;  %v1356_v14 = vld [vmem:[#allocation6 + $0x134] sm:$0xf0]  ;;  %v1271_v15 = vld [vmem:[#allocation6 + $0x2a0] sm:$0xf]  ;;  %v1353_v19 = vld [vmem:[#allocation6 + $0x124] sm:$0xf] }
  0x14   :  { %v1404_v16 = vld [vmem:[#allocation6 + $0x2b4] sm:$0xf0]  ;;  %753 = vmatpush.bf16.msra.mxu1 %v1296_v8  ;;  %766 = vmatpush.bf16.msra.mxu2 %v1108_v9  ;;  %v1080_v17 = vor.u32 %v1356_v14, %v1079_v12  ;;  %v1081_v20 = vld [vmem:[#allocation6 + $0x138] sm:$0xf0]  ;;  %v1401_v21 = vld [vmem:[#allocation6 + $0x2a4] sm:$0xf] }
  0x15   :  { %v1272_v18 = vor.u32 %v1404_v16, %v1271_v15  ;;  %779 = vmatpush.bf16.msra.mxu3 %v1300_v13  ;;  %v1084_v22 = vor.u32 %v1353_v19, %v1081_v20  ;;  %v1273_v23 = vld [vmem:[#allocation6 + $0x2b8] sm:$0xf0]  ;;  %v1055_v24 = vld [vmem:[#allocation6 + $0xf0] sm:$0xf]  ;;  %v1350_v25 = vld [vmem:[#allocation6 + $0x104] sm:$0xf0] }
  0x16   :  { %v1276_v26 = vor.u32 %v1401_v21, %v1273_v23  ;;  %v1247_v27 = vld [vmem:[#allocation6 + $0x270] sm:$0xf]  ;;  %v1398_v28 = vld [vmem:[#allocation6 + $0x284] sm:$0xf0]  ;;  %v1347_v29 = vld [vmem:[#allocation6 + $0xf4] sm:$0xf]  ;;  %v1056_v30 = vor.u32 %v1350_v25, %v1055_v24 }
  0x17   :  { %741 = vmatpush.bf16.msra.mxu0 %v1080_v17  ;;  %v1057_v31 = vld [vmem:[#allocation6 + $0x108] sm:$0xf0]  ;;  %v1395_v32 = vld [vmem:[#allocation6 + $0x274] sm:$0xf]  ;;  %v1248_v34 = vor.u32 %v1398_v28, %v1247_v27  ;;  %v1031_v36 = vld [vmem:[#allocation6 + $0xc0] sm:$0xf] }
  0x18   :  { %v1249_v33 = vld [vmem:[#allocation6 + $0x288] sm:$0xf0]  ;;  %754 = vmatpush.bf16.msra.mxu1 %v1272_v18  ;;  %767 = vmatpush.bf16.msra.mxu2 %v1084_v22  ;;  %v1060_v35 = vor.u32 %v1347_v29, %v1057_v31  ;;  %v1344_v37 = vld [vmem:[#allocation6 + $0xd4] sm:$0xf0]  ;;  %v1223_v38 = vld [vmem:[#allocation6 + $0x240] sm:$0xf] }
  0x19   :  { %780 = vmatpush.bf16.msra.mxu3 %v1276_v26  ;;  %v1252_v39 = vor.u32 %v1395_v32, %v1249_v33  ;;  %v1392_v40 = vld [vmem:[#allocation6 + $0x254] sm:$0xf0]  ;;  %v1341_v41 = vld [vmem:[#allocation6 + $0xc4] sm:$0xf]  ;;  %v1033_v42 = vld [vmem:[#allocation6 + $0xd8] sm:$0xf0]  ;;  %v1032_v45 = vor.u32 %v1344_v37, %v1031_v36 }
  0x1a   :  { %v1389_v43 = vld [vmem:[#allocation6 + $0x244] sm:$0xf]  ;;  %v1225_v44 = vld [vmem:[#allocation6 + $0x258] sm:$0xf0]  ;;  %v1224_v46 = vor.u32 %v1392_v40, %v1223_v38  ;;  %v1036_v47 = vor.u32 %v1341_v41, %v1033_v42  ;;  %v1007_v48 = vld [vmem:[#allocation6 + $0x90] sm:$0xf] }
  0x1b   :  { %742 = vmatpush.bf16.msra.mxu0 %v1056_v30  ;;  %v1338_v49 = vld [vmem:[#allocation6 + $0xa4] sm:$0xf0]  ;;  %v1199_v50 = vld [vmem:[#allocation6 + $0x210] sm:$0xf]  ;;  %v1228_v51 = vor.u32 %v1389_v43, %v1225_v44  ;;  %v1335_v53 = vld [vmem:[#allocation6 + $0x94] sm:$0xf] }
  0x1c   :  { %755 = vmatpush.bf16.msra.mxu1 %v1248_v34  ;;  %768 = vmatpush.bf16.msra.mxu2 %v1060_v35  ;;  %v1386_v52 = vld [vmem:[#allocation6 + $0x224] sm:$0xf0]  ;;  %v1009_v54 = vld [vmem:[#allocation6 + $0xa8] sm:$0xf0]  ;;  %v1383_v55 = vld [vmem:[#allocation6 + $0x214] sm:$0xf]  ;;  %v1008_v57 = vor.u32 %v1338_v49, %v1007_v48 }
  0x1d   :  { %781 = vmatpush.bf16.msra.mxu3 %v1252_v39  ;;  %v1201_v56 = vld [vmem:[#allocation6 + $0x228] sm:$0xf0]  ;;  %v1200_v58 = vor.u32 %v1386_v52, %v1199_v50  ;;  %v1012_v59 = vor.u32 %v1335_v53, %v1009_v54  ;;  %v983_v60 = vld [vmem:[#allocation6 + $0x60] sm:$0xf]  ;;  %v1332_v61 = vld [vmem:[#allocation6 + $0x74] sm:$0xf0] }
  0x1e   :  { %v1175_v62 = vld [vmem:[#allocation6 + $0x1e0] sm:$0xf]  ;;  %v1204_v63 = vor.u32 %v1383_v55, %v1201_v56  ;;  %v1380_v0 = vld [vmem:[#allocation6 + $0x1f4] sm:$0xf0]  ;;  %v1329_v1 = vld [vmem:[#allocation6 + $0x64] sm:$0xf]  ;;  %v984_v5 = vor.u32 %v1332_v61, %v983_v60 }
  0x1f   :  { %743 = vmatpush.bf16.msra.mxu0 %v1032_v45  ;;  %v985_v2 = vld [vmem:[#allocation6 + $0x78] sm:$0xf0]  ;;  %v1377_v3 = vld [vmem:[#allocation6 + $0x1e4] sm:$0xf]  ;;  %v1176_v6 = vor.u32 %v1380_v0, %v1175_v62  ;;  %v959_v8 = vld [vmem:[#allocation6 + $0x30] sm:$0xf] }
  0x20   :  { %756 = vmatpush.bf16.msra.mxu1 %v1224_v46  ;;  %769 = vmatpush.bf16.msra.mxu2 %v1036_v47  ;;  %v1177_v4 = vld [vmem:[#allocation6 + $0x1f8] sm:$0xf0]  ;;  %v988_v7 = vor.u32 %v1329_v1, %v985_v2  ;;  %v1326_v9 = vld [vmem:[#allocation6 + $0x44] sm:$0xf0]  ;;  %v1151_v10 = vld [vmem:[#allocation6 + $0x1b0] sm:$0xf] }
  0x21   :  { %782 = vmatpush.bf16.msra.mxu3 %v1228_v51  ;;  %v1180_v11 = vor.u32 %v1377_v3, %v1177_v4  ;;  %v1374_v12 = vld [vmem:[#allocation6 + $0x1c4] sm:$0xf0]  ;;  %v1323_v13 = vld [vmem:[#allocation6 + $0x34] sm:$0xf]  ;;  %v961_v14 = vld [vmem:[#allocation6 + $0x48] sm:$0xf0]  ;;  %v960_v17 = vor.u32 %v1326_v9, %v959_v8 }
  0x22   :  { %v1371_v15 = vld [vmem:[#allocation6 + $0x1b4] sm:$0xf]  ;;  %v1153_v16 = vld [vmem:[#allocation6 + $0x1c8] sm:$0xf0]  ;;  %v935_v18 = vld [vmem:[#allocation6] sm:$0xf]  ;;  %v1152_v20 = vor.u32 %v1374_v12, %v1151_v10  ;;  %v964_v21 = vor.u32 %v1323_v13, %v961_v14 }
  0x23   :  { %744 = vmatpush.bf16.msra.mxu0 %v1008_v57  ;;  %v1320_v19 = vld [vmem:[#allocation6 + $0x14] sm:$0xf0]  ;;  %v1127_v22 = vld [vmem:[#allocation6 + $0x180] sm:$0xf]  ;;  %v1317_v24 = vld [vmem:[#allocation6 + $0x4] sm:$0xf]  ;;  %v1156_v25 = vor.u32 %v1371_v15, %v1153_v16 }
  0x24   :  { %757 = vmatpush.bf16.msra.mxu1 %v1200_v58  ;;  %770 = vmatpush.bf16.msra.mxu2 %v1012_v59  ;;  %v1368_v23 = vld [vmem:[#allocation6 + $0x194] sm:$0xf0]  ;;  %v937_v26 = vld [vmem:[#allocation6 + $0x18] sm:$0xf0]  ;;  %v1365_v27 = vld [vmem:[#allocation6 + $0x184] sm:$0xf]  ;;  %v936_v32 = vor.u32 %v1320_v19, %v935_v18 }
  0x25   :  { %783 = vmatpush.bf16.msra.mxu3 %v1204_v63  ;;  %v1129_v28 = vld [vmem:[#allocation6 + $0x198] sm:$0xf0]  ;;  %v1111_v29 = vld [vmem:[#allocation6 + $0x158] sm:$0xf]  ;;  %v1363_v30 = vld [vmem:[#allocation6 + $0x16c] sm:$0xf0]  ;;  %v1128_v36 = vor.u32 %v1368_v23, %v1127_v22  ;;  %v940_v37 = vor.u32 %v1317_v24, %v937_v26 }
  0x26   :  { %v1303_v31 = vld [vmem:[#allocation6 + $0x2d8] sm:$0xf]  ;;  %v1411_v33 = vld [vmem:[#allocation6 + $0x2ec] sm:$0xf0]  ;;  %v1360_v34 = vld [vmem:[#allocation6 + $0x15c] sm:$0xf]  ;;  %v1132_v40 = vor.u32 %v1365_v27, %v1129_v28  ;;  %v1112_v41 = vor.u32 %v1363_v30, %v1111_v29 }
  0x27   :  { %745 = vmatpush.bf16.msra.mxu0 %v984_v5  ;;  %v1113_v35 = vld [vmem:[#allocation6 + $0x170] sm:$0xf0]  ;;  %v1408_v38 = vld [vmem:[#allocation6 + $0x2dc] sm:$0xf]  ;;  %v1304_v42 = vor.u32 %v1411_v33, %v1303_v31  ;;  %v1087_v44 = vld [vmem:[#allocation6 + $0x128] sm:$0xf] }
  0x28   :  { %758 = vmatpush.bf16.msra.mxu1 %v1176_v6  ;;  %771 = vmatpush.bf16.msra.mxu2 %v988_v7  ;;  %v1305_v39 = vld [vmem:[#allocation6 + $0x2f0] sm:$0xf0]  ;;  %v1116_v43 = vor.u32 %v1360_v34, %v1113_v35  ;;  %v1357_v45 = vld [vmem:[#allocation6 + $0x13c] sm:$0xf0]  ;;  %v1279_v46 = vld [vmem:[#allocation6 + $0x2a8] sm:$0xf] }
  0x29   :  { %784 = vmatpush.bf16.msra.mxu3 %v1180_v11  ;;  %v1308_v47 = vor.u32 %v1408_v38, %v1305_v39  ;;  %v1405_v48 = vld [vmem:[#allocation6 + $0x2bc] sm:$0xf0]  ;;  %v1354_v49 = vld [vmem:[#allocation6 + $0x12c] sm:$0xf]  ;;  %v1089_v50 = vld [vmem:[#allocation6 + $0x140] sm:$0xf0]  ;;  %v1088_v53 = vor.u32 %v1357_v45, %v1087_v44 }
  0x2a   :  { %v1402_v51 = vld [vmem:[#allocation6 + $0x2ac] sm:$0xf]  ;;  %v1281_v52 = vld [vmem:[#allocation6 + $0x2c0] sm:$0xf0]  ;;  %v1280_v54 = vor.u32 %v1405_v48, %v1279_v46  ;;  %v1092_v55 = vor.u32 %v1354_v49, %v1089_v50  ;;  %v1063_v56 = vld [vmem:[#allocation6 + $0xf8] sm:$0xf] }
  0x2b   :  { %746 = vmatpush.bf16.msra.mxu0 %v960_v17  ;;  %v1351_v57 = vld [vmem:[#allocation6 + $0x10c] sm:$0xf0]  ;;  %v1255_v58 = vld [vmem:[#allocation6 + $0x278] sm:$0xf]  ;;  %v1284_v59 = vor.u32 %v1402_v51, %v1281_v52  ;;  %v1348_v61 = vld [vmem:[#allocation6 + $0xfc] sm:$0xf] }
  0x2c   :  { %759 = vmatpush.bf16.msra.mxu1 %v1152_v20  ;;  %772 = vmatpush.bf16.msra.mxu2 %v964_v21  ;;  %v1399_v60 = vld [vmem:[#allocation6 + $0x28c] sm:$0xf0]  ;;  %v1065_v62 = vld [vmem:[#allocation6 + $0x110] sm:$0xf0]  ;;  %v1396_v63 = vld [vmem:[#allocation6 + $0x27c] sm:$0xf]  ;;  %v1064_v1 = vor.u32 %v1351_v57, %v1063_v56 }
  0x2d   :  { %785 = vmatpush.bf16.msra.mxu3 %v1156_v25  ;;  %v1257_v0 = vld [vmem:[#allocation6 + $0x290] sm:$0xf0]  ;;  %v1414_v2 = vld [vmem:[#allocation3] sm:$0xff]   ;;  %v1256_v3 = vor.u32 %v1399_v60, %v1255_v58  ;;  %v1068_v4 = vor.u32 %v1348_v61, %v1065_v62  ;;  %v1039_v5 = vld [vmem:[#allocation6 + $0xc8] sm:$0xf]  ;;  %vm118_vm1 = vcmask 1041408  }
  0x2e   :  { %v1345_v6 = vld [vmem:[#allocation6 + $0xdc] sm:$0xf0]  ;;  %v1231_v7 = vld [vmem:[#allocation6 + $0x248] sm:$0xf]  ;;  %v1415_v8 = vunpack.c.l.bf16 %v1414_v2  ;;  %v1416_v9 = vunpack.c.h.bf16 %v1414_v2  ;;  %v1260_v10 = vor.u32 %v1396_v63, %v1257_v0  ;;  %v1342_v12 = vld [vmem:[#allocation6 + $0xcc] sm:$0xf] }
  0x2f   :  { %747 = vmatpush.bf16.msra.mxu0 %v936_v32  ;;  %v1393_v11 = vld [vmem:[#allocation6 + $0x25c] sm:$0xf0]  ;;  %v1041_v13 = vld [vmem:[#allocation6 + $0xe0] sm:$0xf0]  ;;  %v1390_v14 = vld [vmem:[#allocation6 + $0x24c] sm:$0xf]  ;;  %v1040_v16 = vor.u32 %v1345_v6, %v1039_v5 }
  0x30   :  { %760 = vmatpush.bf16.msra.mxu1 %v1128_v36  ;;  %773 = vmatpush.bf16.msra.mxu2 %v940_v37  ;;  %v1233_v15 = vld [vmem:[#allocation6 + $0x260] sm:$0xf0]  ;;  %72 = vst [vmem:[#allocation1] ss:$2 sm:$0xff] %v1415_v8  ;;  %v1015_v17 = vld [vmem:[#allocation6 + $0x98] sm:$0xf]  ;;  %v1232_v19 = vor.u32 %v1393_v11, %v1231_v7  ;;  %v1044_v20 = vor.u32 %v1342_v12, %v1041_v13 }
  0x31   :  { %786 = vmatpush.bf16.msra.mxu3 %v1132_v40  ;;  %v1339_v18 = vld [vmem:[#allocation6 + $0xac] sm:$0xf0]  ;;  %76 = vst [vmem:[#allocation1 + $0x10] ss:$2 sm:$0xff] %v1416_v9  ;;  %v1207_v21 = vld [vmem:[#allocation6 + $0x218] sm:$0xf]  ;;  %v1236_v24 = vor.u32 %v1390_v14, %v1233_v15 }
  0x32   :  { %v1387_v22 = vld [vmem:[#allocation6 + $0x22c] sm:$0xf0]  ;;  %v1336_v23 = vld [vmem:[#allocation6 + $0x9c] sm:$0xf]  ;;  %v1017_v25 = vld [vmem:[#allocation6 + $0xb0] sm:$0xf0]  ;;  %v1016_v31 = vor.u32 %v1339_v18, %v1015_v17 }
  0x33   :  { %792 = vmatpush.bf16.msrb.mxu0 %v1112_v41  ;;  %v1384_v26 = vld [vmem:[#allocation6 + $0x21c] sm:$0xf]  ;;  %v1209_v27 = vld [vmem:[#allocation6 + $0x230] sm:$0xf0]  ;;  %v991_v28 = vld [vmem:[#allocation6 + $0x68] sm:$0xf]  ;;  %v1208_v35 = vor.u32 %v1387_v22, %v1207_v21  ;;  %v1020_v36 = vor.u32 %v1336_v23, %v1017_v25 }
  0x34   :  { %805 = vmatpush.bf16.msrb.mxu1 %v1304_v42  ;;  %818 = vmatpush.bf16.msrb.mxu2 %v1116_v43  ;;  %v1333_v29 = vld [vmem:[#allocation6 + $0x7c] sm:$0xf0]  ;;  %v1183_v30 = vld [vmem:[#allocation6 + $0x1e8] sm:$0xf]  ;;  %v1330_v33 = vld [vmem:[#allocation6 + $0x6c] sm:$0xf]  ;;  %v1212_v39 = vor.u32 %v1384_v26, %v1209_v27 }
  0x35   :  { %831 = vmatpush.bf16.msrb.mxu3 %v1308_v47  ;;  %v1381_v32 = vld [vmem:[#allocation6 + $0x1fc] sm:$0xf0]  ;;  %v993_v34 = vld [vmem:[#allocation6 + $0x80] sm:$0xf0]  ;;  %v1378_v37 = vld [vmem:[#allocation6 + $0x1ec] sm:$0xf]  ;;  %v992_v42 = vor.u32 %v1333_v29, %v991_v28 }
  0x36   :  { %v1185_v38 = vld [vmem:[#allocation6 + $0x200] sm:$0xf0]  ;;  %v1184_v43 = vor.u32 %v1381_v32, %v1183_v30  ;;  %v996_v44 = vor.u32 %v1330_v33, %v993_v34  ;;  %v967_v8 = vld [vmem:[#allocation6 + $0x38] sm:$0xf]  ;;  %v1327_v9 = vld [vmem:[#allocation6 + $0x4c] sm:$0xf0] }
  0x37   :  { %793 = vmatpush.bf16.msrb.mxu0 %v1088_v53  ;;  %v73_v40 = vld.sshfl [vmem:[#allocation1] sm:$0xff pattern:$0x75316420]  ;;  %v74_v41 = vld.sshfl [vmem:[#allocation1 + $0x8] sm:$0xff pattern:$0x75316420]  ;;  %v968_v18 = vor.u32 %v1327_v9, %v967_v8 }
  0x38   :  { %806 = vmatpush.bf16.msrb.mxu1 %v1280_v54  ;;  %819 = vmatpush.bf16.msrb.mxu2 %v1092_v55  ;;  %v77_v45 = vld.sshfl [vmem:[#allocation1 + $0x10] sm:$0xff pattern:$0x75316420]  ;;  %v78_v46 = vld.sshfl [vmem:[#allocation1 + $0x18] sm:$0xff pattern:$0x75316420]  ;;  %v1188_v55 = vor.u32 %v1378_v37, %v1185_v38 }
  0x39   :  { %832 = vmatpush.bf16.msrb.mxu3 %v1284_v59  ;;  %v84_v47 = vsel %vm83_vm0, %v73_v40, 0.0  ;;  %v91_v48 = vsel %vm83_vm0, %v74_v41, 0.0  ;;  %v98_v49 = vsel %vm83_vm0, %v77_v45, 0.0  ;;  %v105_v50 = vsel %vm83_vm0, %v78_v46, 0.0  ;;  %v1375_v15 = vld [vmem:[#allocation6 + $0x1cc] sm:$0xf0] }
  0x3a   :  { %v85_v51 = vrot.slane %v84_v47, 4  ;;  %v92_v52 = vrot.slane %v91_v48, 4  ;;  %v99_v53 = vrot.slane %v98_v49, 4  ;;  %v106_v54 = vrot.slane %v105_v50, 4  ;;  %v969_v17 = vld [vmem:[#allocation6 + $0x50] sm:$0xf0] }
  0x3b   :  { %794 = vmatpush.bf16.msrb.mxu0 %v1064_v1  ;;  %vm126_vm2 = vcmask 1041409   ;;  %v1372_v21 = vld [vmem:[#allocation6 + $0x1bc] sm:$0xf]  ;;  %v1161_v22 = vld [vmem:[#allocation6 + $0x1d0] sm:$0xf0]  ;;  %vm128_vm3 = vcmask 1043459  }
  0x3c   :  { %807 = vmatpush.bf16.msrb.mxu1 %v1256_v3  ;;  %820 = vmatpush.bf16.msrb.mxu2 %v1068_v4  ;;  %v86_v56 = vadd.f32 %v85_v51, %v84_v47  ;;  %v93_v57 = vadd.f32 %v92_v52, %v91_v48  ;;  %v100_v58 = vadd.f32 %v99_v53, %v98_v49  ;;  %v943_v26 = vld [vmem:[#allocation6 + $0x8] sm:$0xf]  ;;  %v1321_v27 = vld [vmem:[#allocation6 + $0x1c] sm:$0xf0]  ;;  %v1137_v37 = vld [vmem:[#allocation6 + $0x1a0] sm:$0xf0] }
  0x3d   :  { %833 = vmatpush.bf16.msrb.mxu3 %v1260_v10  ;;  %v107_v59 = vadd.f32 %v106_v54, %v105_v50  ;;  %v1159_v10 = vld [vmem:[#allocation6 + $0x1b8] sm:$0xf]  ;;  %v1164_v25 = vor.u32 %v1372_v21, %v1161_v22  ;;  %v944_v28 = vor.u32 %v1321_v27, %v943_v26  ;;  %v1135_v29 = vld [vmem:[#allocation6 + $0x188] sm:$0xf]  ;;  %v1369_v30 = vld [vmem:[#allocation6 + $0x19c] sm:$0xf0] }
  0x3e   :  { %v87_v60 = vrot.slane %v86_v56, 2  ;;  %v94_v61 = vrot.slane %v93_v57, 2  ;;  %v101_v62 = vrot.slane %v100_v58, 2  ;;  %v1136_v34 = vor.u32 %v1369_v30, %v1135_v29  ;;  %v1119_v49 = vld [vmem:[#allocation6 + $0x160] sm:$0xf]  ;;  %s1536_s0 = smov [#allocation9]  }
  0x3f   :  { %795 = vmatpush.bf16.msrb.mxu0 %v1040_v16  ;;  %v108_v63 = vrot.slane %v107_v59, 2  ;;  %v1324_v16 = vld [vmem:[#allocation6 + $0x3c] sm:$0xf]  ;;  %vm130_vm4 = vcmask 1045509   ;;  %vm132_vm5 = vcmask 1047559   ;;  %vm907_vm6 = vcmask 1045508  }
  0x40   :  { %808 = vmatpush.bf16.msrb.mxu1 %v1232_v19  ;;  %821 = vmatpush.bf16.msrb.mxu2 %v1044_v20  ;;  %v88_v0 = vadd.f32 %v87_v60, %v86_v56  ;;  %v95_v1 = vadd.f32 %v94_v61, %v93_v57  ;;  %v102_v2 = vadd.f32 %v101_v62, %v100_v58  ;;  %v1364_v50 = vld [vmem:[#allocation6 + $0x174] sm:$0xf0]  ;;  %v1311_v51 = vld [vmem:[#allocation6 + $0x2e0] sm:$0xf]  ;;  %v1361_v53 = vld [vmem:[#allocation6 + $0x164] sm:$0xf] }
  0x41   :  { %834 = vmatpush.bf16.msrb.mxu3 %v1236_v24  ;;  %v109_v3 = vadd.f32 %v108_v63, %v107_v59  ;;  %v1160_v19 = vor.u32 %v1375_v15, %v1159_v10  ;;  %v972_v20 = vor.u32 %v1324_v16, %v969_v17  ;;  %v1412_v52 = vld [vmem:[#allocation6 + $0x2f4] sm:$0xf0]  ;;  %v1121_v54 = vld [vmem:[#allocation6 + $0x178] sm:$0xf0]  ;;  %v1120_v61 = vor.u32 %v1364_v50, %v1119_v49  ;;  %v1095_v63 = vld [vmem:[#allocation6 + $0x130] sm:$0xf] }
  0x42   :  { %v89_v4 = vrot.slane %v88_v0, 1  ;;  %v96_v5 = vrot.slane %v95_v1, 1  ;;  %v103_v6 = vrot.slane %v102_v2, 1  ;;  %v1313_v56 = vld [vmem:[#allocation6 + $0x2f8] sm:$0xf0]  ;;  %v1312_v62 = vor.u32 %v1412_v52, %v1311_v51  ;;  %s920_s2 = sshll.u32 %s1536_s0, 4  ;;  %s921_s2 = int_to_ptr.vmem [resolvable:$true] %s920_s2 }
  0x43   :  { %796 = vmatpush.bf16.msrb.mxu0 %v1016_v31  ;;  %v110_v7 = vrot.slane %v109_v3, 1  ;;  %v1318_v31 = vld [vmem:[#allocation6 + $0xc] sm:$0xf]  ;;  %v1263_v15 = vld [vmem:[#allocation6 + $0x280] sm:$0xf]  ;;  %s922_s5 = sshll.u32 %s1598_s3, 4  ;;  %s923_s5 = int_to_ptr.hbm [resolvable:$true] %s922_s5 }
  0x44   :  { %809 = vmatpush.bf16.msrb.mxu1 %v1208_v35  ;;  %822 = vmatpush.bf16.msrb.mxu2 %v1020_v36  ;;  %v90_v11 = vadd.f32 %v89_v4, %v88_v0  ;;  %v97_v12 = vadd.f32 %v96_v5, %v95_v1  ;;  %v104_v13 = vadd.f32 %v103_v6, %v102_v2  ;;  %v945_v35 = vld [vmem:[#allocation6 + $0x20] sm:$0xf0]  ;;  %v1366_v36 = vld [vmem:[#allocation6 + $0x18c] sm:$0xf]  ;;  %v1358_v0 = vld [vmem:[#allocation6 + $0x144] sm:$0xf0] }
  0x45   :  { %835 = vmatpush.bf16.msrb.mxu3 %v1212_v39  ;;  %v111_v14 = vadd.f32 %v110_v7, %v109_v3  ;;  %v948_v39 = vor.u32 %v1318_v31, %v945_v35  ;;  %v1140_v40 = vor.u32 %v1366_v36, %v1137_v37  ;;  %v1124_v1 = vor.u32 %v1361_v53, %v1121_v54  ;;  %v1287_v3 = vld [vmem:[#allocation6 + $0x2b0] sm:$0xf]  ;;  %v1406_v4 = vld [vmem:[#allocation6 + $0x2c4] sm:$0xf0]  ;;  %v1355_v5 = vld [vmem:[#allocation6 + $0x134] sm:$0xf] }
  0x46   :  { %v116_v23 = vrot.slane %v97_v12, 6  ;;  %v1097_v6 = vld [vmem:[#allocation6 + $0x148] sm:$0xf0]  ;;  %v1403_v7 = vld [vmem:[#allocation6 + $0x2b4] sm:$0xf]  ;;  %v1096_v9 = vor.u32 %v1358_v0, %v1095_v63  ;;  %v1288_v10 = vor.u32 %v1406_v4, %v1287_v3 }
  0x47   :  { %797 = vmatpush.bf16.msrb.mxu0 %v992_v42  ;;  %v117_v24 = vrot.slane %v111_v14, 6  ;;  %v65_v42 = vld [vmem:[#allocation2] sm:$0xf]  ;;  %v1289_v8 = vld [vmem:[#allocation6 + $0x2c8] sm:$0xf0] }
  0x48   :  { %810 = vmatpush.bf16.msrb.mxu1 %v1184_v43  ;;  %823 = vmatpush.bf16.msrb.mxu2 %v996_v44  ;;  %v119_v32 = vsel %vm118_vm1, %v90_v11, %v116_v23  ;;  %v1071_v11 = vld [vmem:[#allocation6 + $0x100] sm:$0xf]  ;;  %v1352_v12 = vld [vmem:[#allocation6 + $0x114] sm:$0xf0]  ;;  %v1292_v14 = vor.u32 %v1403_v7, %v1289_v8  ;;  %v1349_v17 = vld [vmem:[#allocation6 + $0x104] sm:$0xf] }
  0x49   :  { %836 = vmatpush.bf16.msrb.mxu3 %v1188_v55  ;;  %v120_v33 = vsel %vm118_vm1, %v104_v13, %v117_v24  ;;  %v1409_v55 = vld [vmem:[#allocation6 + $0x2e4] sm:$0xf]  ;;  %v1100_v13 = vor.u32 %v1355_v5, %v1097_v6  ;;  %v1400_v16 = vld [vmem:[#allocation6 + $0x294] sm:$0xf0]  ;;  %v1072_v21 = vor.u32 %v1352_v12, %v1071_v11  ;;  %v1047_v23 = vld [vmem:[#allocation6 + $0xd0] sm:$0xf] }
  0x4a   :  { %v125_v38 = vrot.slane %v120_v33, 7  ;;  %v1316_v2 = vor.u32 %v1409_v55, %v1313_v56  ;;  %v1264_v22 = vor.u32 %v1400_v16, %v1263_v15  ;;  %v1346_v24 = vld [vmem:[#allocation6 + $0xe4] sm:$0xf0]  ;;  %v1239_v27 = vld [vmem:[#allocation6 + $0x250] sm:$0xf] }
  0x4b   :  { %798 = vmatpush.bf16.msrb.mxu0 %v968_v18  ;;  %v1073_v18 = vld [vmem:[#allocation6 + $0x118] sm:$0xf0]  ;;  %v1343_v29 = vld [vmem:[#allocation6 + $0xd4] sm:$0xf]  ;;  %v1049_v30 = vld [vmem:[#allocation6 + $0xe8] sm:$0xf0]  ;;  %v1048_v33 = vor.u32 %v1346_v24, %v1047_v23 }
  0x4c   :  { %811 = vmatpush.bf16.msrb.mxu1 %v1160_v19  ;;  %824 = vmatpush.bf16.msrb.mxu2 %v972_v20  ;;  %v127_v41 = vsel %vm126_vm2, %v125_v38, %v119_v32  ;;  %v1397_v19 = vld [vmem:[#allocation6 + $0x284] sm:$0xf]  ;;  %v1265_v20 = vld [vmem:[#allocation6 + $0x298] sm:$0xf0]  ;;  %v1391_v31 = vld [vmem:[#allocation6 + $0x254] sm:$0xf]  ;;  %v1052_v37 = vor.u32 %v1343_v29, %v1049_v30 }
  0x4d   :  { %837 = vmatpush.bf16.msrb.mxu3 %v1164_v25  ;;  %v129_v43 = vsel %vm128_vm3, %v125_v38, %v127_v41  ;;  %v1076_v25 = vor.u32 %v1349_v17, %v1073_v18  ;;  %v1268_v26 = vor.u32 %v1397_v19, %v1265_v20  ;;  %v1241_v32 = vld [vmem:[#allocation6 + $0x268] sm:$0xf0]  ;;  %v1023_v35 = vld [vmem:[#allocation6 + $0xa0] sm:$0xf]  ;;  %v1340_v36 = vld [vmem:[#allocation6 + $0xb4] sm:$0xf0] }
  0x4e   :  { %v131_v44 = vsel %vm130_vm4, %v125_v38, %v129_v43  ;;  %v1337_v41 = vld [vmem:[#allocation6 + $0xa4] sm:$0xf]  ;;  %v1191_v51 = vld [vmem:[#allocation6 + $0x1f0] sm:$0xf]  ;;  %v1382_v52 = vld [vmem:[#allocation6 + $0x204] sm:$0xf0] }
  0x4f   :  { %799 = vmatpush.bf16.msrb.mxu0 %v944_v28  ;;  %v133_v45 = vsel %vm132_vm5, %v125_v38, %v131_v44  ;;  %v1394_v28 = vld [vmem:[#allocation6 + $0x264] sm:$0xf0]  ;;  %v1244_v38 = vor.u32 %v1391_v31, %v1241_v32  ;;  %v1385_v43 = vld [vmem:[#allocation6 + $0x224] sm:$0xf]  ;;  %v1217_v44 = vld [vmem:[#allocation6 + $0x238] sm:$0xf0] }
  0x50   :  { %812 = vmatpush.bf16.msrb.mxu1 %v1136_v34  ;;  %825 = vmatpush.bf16.msrb.mxu2 %v948_v39  ;;  %v135_v46 = vadd.f32 %v133_v45, %v65_v42  ;;  %v1240_v34 = vor.u32 %v1394_v28, %v1239_v27  ;;  %v1215_v39 = vld [vmem:[#allocation6 + $0x220] sm:$0xf]  ;;  %v1025_v42 = vld [vmem:[#allocation6 + $0xb8] sm:$0xf0]  ;;  %v1024_v45 = vor.u32 %v1340_v36, %v1023_v35  ;;  %v1331_v53 = vld [vmem:[#allocation6 + $0x74] sm:$0xf] }
  0x51   :  { %838 = vmatpush.bf16.msrb.mxu3 %v1140_v40  ;;  %v1388_v40 = vld [vmem:[#allocation6 + $0x234] sm:$0xf0]  ;;  %v1028_v49 = vor.u32 %v1337_v41, %v1025_v42  ;;  %v1220_v50 = vor.u32 %v1385_v43, %v1217_v44  ;;  %v1001_v54 = vld [vmem:[#allocation6 + $0x88] sm:$0xf0]  ;;  %v1379_v55 = vld [vmem:[#allocation6 + $0x1f4] sm:$0xf] }
  0x52   :  { %136 = vst [vmem:[#allocation2] sm:$0xf] %v135_v46  ;;  %v1216_v46 = vor.u32 %v1388_v40, %v1215_v39  ;;  %v1193_v56 = vld [vmem:[#allocation6 + $0x208] sm:$0xf0]  ;;  %v1004_v63 = vor.u32 %v1331_v53, %v1001_v54  ;;  %v1325_v3 = vld [vmem:[#allocation6 + $0x44] sm:$0xf] }
  0x53   :  { %v1196_v0 = vor.u32 %v1379_v55, %v1193_v56  ;;  %v977_v4 = vld [vmem:[#allocation6 + $0x58] sm:$0xf0]  ;;  %v1373_v5 = vld [vmem:[#allocation6 + $0x1c4] sm:$0xf]  ;;  %v1319_v15 = vld [vmem:[#allocation6 + $0x14] sm:$0xf] }
  0x54   :  { %v1169_v6 = vld [vmem:[#allocation6 + $0x1d8] sm:$0xf0]  ;;  %v980_v11 = vor.u32 %v1325_v3, %v977_v4  ;;  %v953_v16 = vld [vmem:[#allocation6 + $0x28] sm:$0xf0]  ;;  %v1367_v17 = vld [vmem:[#allocation6 + $0x194] sm:$0xf] }
  0x55   :  { %v1172_v12 = vor.u32 %v1373_v5, %v1169_v6  ;;  %v1145_v18 = vld [vmem:[#allocation6 + $0x1a8] sm:$0xf0]  ;;  %v246_v29 = vld [vmem:[#allocation8] sm:$0x3f] }
  0x56   :  { %v249_v30 = vperm.slane %v246_v29, 1  ;;  %v251_v39 = vperm.slane %v246_v29, 3 }
  0x59   :  { %v140_v47 = vld [vmem:[#allocation2] sm:$0xf] }
  0x5a   :  { %v141_v48 = vmul.f32 0.0009803922, %v140_v47  ;;  %v999_v47 = vld [vmem:[#allocation6 + $0x70] sm:$0xf] }
  0x5c   :  { %143 = vst [vmem:[#allocation1] ss:$4 sm:$0xff] %v141_v48  ;;  %v1334_v48 = vld [vmem:[#allocation6 + $0x84] sm:$0xf0] }
  0x63   :  { %v144_v57 = vld.sshfl [vmem:[#allocation1] sm:$0xff pattern:$0x73625140]  ;;  %v145_v58 = vld.sshfl [vmem:[#allocation1 + $0x8] sm:$0xff pattern:$0x73625140] }
  0x64   :  { %v1573_v59 = vpack.c.bf16 %v144_v57, %v144_v57  ;;  %v1575_v60 = vpack.c.bf16 %v145_v58, %v145_v58  ;;  %v1000_v57 = vor.u32 %v1334_v48, %v999_v47  ;;  %v1192_v58 = vor.u32 %v1382_v52, %v1191_v51 }
  0x66   :  { %774 = vmatmul.bf16.vlgmr.msra.gmra.mxu2 %v1573_v59  ;;  %787 = vmatmul.bf16.vlgmr.msra.gmra.mxu3 %v1575_v60 }
  0x67   :  { %748 = vmatmul.bf16.vlgmr.msra.gmra.mxu0 %v1573_v59  ;;  %761 = vmatmul.bf16.vlgmr.msra.gmra.mxu1 %v1575_v60 }
  0x68   :  { %844 = vmatpush.bf16.msra.mxu0 %v1120_v61  ;;  %857 = vmatpush.bf16.msra.mxu1 %v1312_v62  ;;  %v975_v61 = vld [vmem:[#allocation6 + $0x40] sm:$0xf]  ;;  %v1328_v62 = vld [vmem:[#allocation6 + $0x54] sm:$0xf0] }
  0x69   :  { %870 = vmatpush.bf16.msra.mxu2 %v1124_v1  ;;  %883 = vmatpush.bf16.msra.mxu3 %v1316_v2  ;;  %v1167_v1 = vld [vmem:[#allocation6 + $0x1c0] sm:$0xf]  ;;  %v1376_v2 = vld [vmem:[#allocation6 + $0x1d4] sm:$0xf0]  ;;  %v976_v7 = vor.u32 %v1328_v62, %v975_v61  ;;  %v253_v61 = vperm.slane %v246_v29, 5 }
  0x6a   :  { %v1168_v8 = vor.u32 %v1376_v2, %v1167_v1 }
  0x6c   :  { %845 = vmatpush.bf16.msra.mxu0 %v1096_v9  ;;  %858 = vmatpush.bf16.msra.mxu1 %v1288_v10  ;;  %v951_v9 = vld [vmem:[#allocation6 + $0x10] sm:$0xf]  ;;  %v1322_v10 = vld [vmem:[#allocation6 + $0x24] sm:$0xf0] }
  0x6d   :  { %871 = vmatpush.bf16.msra.mxu2 %v1100_v13  ;;  %884 = vmatpush.bf16.msra.mxu3 %v1292_v14  ;;  %v1143_v13 = vld [vmem:[#allocation6 + $0x190] sm:$0xf]  ;;  %v1370_v14 = vld [vmem:[#allocation6 + $0x1a4] sm:$0xf0]  ;;  %v952_v19 = vor.u32 %v1322_v10, %v951_v9 }
  0x6e   :  { %v1144_v20 = vor.u32 %v1370_v14, %v1143_v13 }
  0x70   :  { %846 = vmatpush.bf16.msra.mxu0 %v1072_v21  ;;  %859 = vmatpush.bf16.msra.mxu1 %v1264_v22  ;;  %v956_v21 = vor.u32 %v1319_v15, %v953_v16  ;;  %v1148_v22 = vor.u32 %v1367_v17, %v1145_v18 }
  0x71   :  { %872 = vmatpush.bf16.msra.mxu2 %v1076_v25  ;;  %885 = vmatpush.bf16.msra.mxu3 %v1268_v26 }
  0x74   :  { %847 = vmatpush.bf16.msra.mxu0 %v1048_v33  ;;  %860 = vmatpush.bf16.msra.mxu1 %v1240_v34  ;;  %v250_v33 = vperm.slane %v246_v29, 2  ;;  %v248_v34 = vperm.slane %v246_v29, 0 }
  0x75   :  { %873 = vmatpush.bf16.msra.mxu2 %v1052_v37  ;;  %886 = vmatpush.bf16.msra.mxu3 %v1244_v38 }
  0x76   :  { %826 = vmatmul.bf16.vlgmr.msrb.gmra.mxu2 %v1573_v59  ;;  %839 = vmatmul.bf16.vlgmr.msrb.gmra.mxu3 %v1575_v60 }
  0x77   :  { %800 = vmatmul.bf16.vlgmr.msrb.gmra.mxu0 %v1573_v59  ;;  %813 = vmatmul.bf16.vlgmr.msrb.gmra.mxu1 %v1575_v60 }
  0x78   :  { %848 = vmatpush.bf16.msra.mxu0 %v1024_v45  ;;  %861 = vmatpush.bf16.msra.mxu1 %v1216_v46 }
  0x79   :  { %874 = vmatpush.bf16.msra.mxu2 %v1028_v49  ;;  %887 = vmatpush.bf16.msra.mxu3 %v1220_v50 }
  0x7c   :  { %849 = vmatpush.bf16.msra.mxu0 %v1000_v57  ;;  %862 = vmatpush.bf16.msra.mxu1 %v1192_v58  ;;  %v252_v58 = vperm.slane %v246_v29, 4 }
  0x7d   :  { %875 = vmatpush.bf16.msra.mxu2 %v1004_v63  ;;  %888 = vmatpush.bf16.msra.mxu3 %v1196_v0 }
  0x80   :  { %850 = vmatpush.bf16.msra.mxu0 %v976_v7  ;;  %863 = vmatpush.bf16.msra.mxu1 %v1168_v8 }
  0x81   :  { %876 = vmatpush.bf16.msra.mxu2 %v980_v11  ;;  %889 = vmatpush.bf16.msra.mxu3 %v1172_v12 }
  0x84   :  { %851 = vmatpush.bf16.msra.mxu0 %v952_v19  ;;  %864 = vmatpush.bf16.msra.mxu1 %v1144_v20 }
  0x85   :  { %877 = vmatpush.bf16.msra.mxu2 %v956_v21  ;;  %890 = vmatpush.bf16.msra.mxu3 %v1148_v22 }
  0x87   :  { %852 = vmatmul.bf16.vlgmr.msra.gmra.mxu0 %v1573_v59  ;;  %865 = vmatmul.bf16.vlgmr.msra.gmra.mxu1 %v1575_v60 }
  0x88   :  { %878 = vmatmul.bf16.vlgmr.msra.gmra.mxu2 %v1573_v59  ;;  %891 = vmatmul.bf16.vlgmr.msra.gmra.mxu3 %v1575_v60 }
  0xe4   :  { %v749_v23 = vpop.f32.mrf.mxu0  ;;  %v762_v24 = vpop.f32.mrf.mxu1 }
  0xe5   :  { %v750_v59 = vadd.f32 %v749_v23, %v248_v34 }
  0xe7   :  { %v763_v44 = vadd.f32 %v762_v24, %v750_v59 }
  0xe9   :  { %v775_v25 = vpop.f32.mrf.mxu2  ;;  %v788_v26 = vpop.f32.mrf.mxu3 }
  0xea   :  { %v776_v35 = vadd.f32 %v775_v25, %v249_v30 }
  0xec   :  { %v751_v27 = vpop.f32.mrf.mxu0  ;;  %v764_v28 = vpop.f32.mrf.mxu1  ;;  %v789_v40 = vadd.f32 %v788_v26, %v776_v35 }
  0xee   :  { %v902_v45 = vrot.slane %v789_v40, 6 }
  0xf0   :  { %v906_v51 = vsel %vm118_vm1, %v763_v44, %v902_v45 }
  0xf1   :  { %v777_v31 = vpop.f32.mrf.mxu2  ;;  %v790_v32 = vpop.f32.mrf.mxu3 }
  0xf4   :  { %v801_v36 = vpop.f32.mrf.mxu0  ;;  %v814_v37 = vpop.f32.mrf.mxu1 }
  0xf5   :  { %v802_v38 = vadd.f32 %v801_v36, %v250_v33 }
  0xf7   :  { %v815_v60 = vadd.f32 %v814_v37, %v802_v38 }
  0xf9   :  { %v827_v41 = vpop.f32.mrf.mxu2  ;;  %v840_v42 = vpop.f32.mrf.mxu3  ;;  %v903_v46 = vrot.slane %v815_v60, 4 }
  0xfa   :  { %v828_v43 = vadd.f32 %v827_v41, %v251_v39 }
  0xfc   :  { %v841_v47 = vadd.f32 %v840_v42, %v828_v43  ;;  %v803_v48 = vpop.f32.mrf.mxu0  ;;  %v816_v49 = vpop.f32.mrf.mxu1 }
  0xfe   :  { %v904_v50 = vrot.slane %v841_v47, 2 }
 0x100   :  { %v908_v52 = vsel %vm907_vm6, %v903_v46, %v904_v50 }
 0x101   :  { %v829_v53 = vpop.f32.mrf.mxu2  ;;  %v842_v54 = vpop.f32.mrf.mxu3  ;;  %v909_v55 = vsel %vm83_vm0, %v906_v51, %v908_v52 }
 0x102   :  { %913 = vst [vmem:[#allocation9] sm:$0xff] %v909_v55 }
 0x104   :  { %v853_v56 = vpop.f32.mrf.mxu0  ;;  %v866_v57 = vpop.f32.mrf.mxu1 }
 0x105   :  { %v854_v0 = vadd.f32 %v853_v56, %v252_v58 }
 0x107   :  { %v867_v5 = vadd.f32 %v866_v57, %v854_v0 }
 0x10b   :  { %v879_v62 = vpop.f32.mrf.mxu2  ;;  %v892_v63 = vpop.f32.mrf.mxu3 }
 0x10c   :  { %v880_v1 = vadd.f32 %v879_v62, %v253_v61  ;;  %v855_v2 = vpop.f32.mrf.mxu0  ;;  %v868_v3 = vpop.f32.mrf.mxu1 }
 0x10e   :  { %v893_v4 = vadd.f32 %v892_v63, %v880_v1 }
 0x110   :  { %v905_v6 = vrot.slane %v893_v4, 6 }
 0x112   :  { %v910_v7 = vsel %vm118_vm1, %v867_v5, %v905_v6 }
 0x113   :  { %914 = vst [vmem:[#allocation9 + $0x8] sm:$0xf] %v910_v7  ;;  %v881_v8 = vpop.f32.mrf.mxu2  ;;  %v894_v9 = vpop.f32.mrf.mxu3 }
 0x114   :  { %925 = dma.vmem_to_hbm [thread:$0]  %s921_s2, 192, %s923_s5, [#allocation5]  }
 0x115   :  { %1526 = dma.done.wait [#allocation5], 192  }
 0x116   :  { %1527 = vsyncadd [#allocation5], 4294967104 }
 0x117   :  { %930 = vsyncpa [#allocation4], 1 }
 0x118   :  { %931 = vsyncpa [#allocation7], 1 }
 0x119   :  { %932 = vsyncpa [#allocation5], 1 }

</bundles_post_ra>
